<compile_context>
chip_gen: v6e
topology: v6e:2x2x1
jax: 0.10.0
libtpu: 0.0.40
codegen_flags: <defaults>
</compile_context>

<pallas_src>
import jax
import jax.numpy as jnp
from jax.experimental import pallas as pl
from jax.experimental.pallas import tpu as pltpu


def _round_up(x, m):
    return ((x + m - 1) // m) * m


def _masked_avg_pool_kernel(x_ref, o_ref, sum_acc, cnt_acc):
    # Grid axes: (batch blocks, feature blocks, seq blocks); seq is last.
    s = pl.program_id(2)

    @pl.when(s == 0)
    def _():
        sum_acc[...] = jnp.zeros_like(sum_acc)
        cnt_acc[...] = jnp.zeros_like(cnt_acc)

    x = x_ref[...]                                            # (TB, TS, TD), native dtype
    sum_acc[...] += jnp.sum(x, axis=1, dtype=jnp.float32)     # accumulate in f32
    cnt_acc[...] += jnp.sum((x != 0).astype(jnp.float32), axis=1)

    @pl.when(s == pl.num_programs(2) - 1)
    def _():
        o_ref[...] = (sum_acc[...] / (cnt_acc[...] + 1e-16)).astype(o_ref.dtype)


def masked_average_pooling(embedding_matrix, *, vmem_tile_budget_bytes=8 << 20):
    """embedding_matrix: (B, S, D) -> (B, D), matching the PyTorch module."""
    B, S, D = embedding_matrix.shape
    itemsize = jnp.dtype(embedding_matrix.dtype).itemsize

    # ---- tile selection -----------------------------------------------------
    # Lane-dense feature tile (multiple of 128, capped at 1024).
    TD = min(1024, _round_up(D, 128))
    Dp = _round_up(D, TD)

    # Sublane-full batch tile; grow (up to 32) to amortize per-grid-step
    # overhead when rows are tiny, but keep >=2 batch blocks (v7x megacore)
    # and avoid over-padding small batches.
    TB = 8
    per_row_bytes = max(S, 1) * Dp * itemsize
    while (TB < 32 and B > TB and per_row_bytes * TB < (1 << 20)
           and (B + 2 * TB - 1) // (2 * TB) >= 2):
        TB *= 2
    Bp = _round_up(B, TB)

    # Sequence tile: cap per-input-buffer bytes (Pallas double-buffers it).
    TS = (vmem_tile_budget_bytes // (TB * TD * itemsize)) // 8 * 8
    TS = max(8, min(TS, _round_up(S, 8)))
    Sp = _round_up(S, TS)

    # ---- zero-pad so blocks tile the array exactly --------------------------
    # Zeros contribute nothing to the sum or the nonzero count; padded
    # rows/lanes are sliced off below.
    if (Bp, Sp, Dp) != (B, S, D):
        x = jnp.pad(embedding_matrix, ((0, Bp - B), (0, Sp - S), (0, Dp - D)))
    else:
        x = embedding_matrix

    grid = (Bp // TB, Dp // TD, Sp // TS)

    out = pl.pallas_call(
        _masked_avg_pool_kernel,
        out_shape=jax.ShapeDtypeStruct((Bp, Dp), jnp.float32),
        grid_spec=pltpu.PrefetchScalarGridSpec(
            num_scalar_prefetch=0,
            grid=grid,
            in_specs=[pl.BlockSpec((TB, TS, TD), lambda b, d, s: (b, s, d))],
            out_specs=pl.BlockSpec((TB, TD), lambda b, d, s: (b, d)),
            scratch_shapes=[pltpu.VMEM((TB, TD), jnp.float32),
                            pltpu.VMEM((TB, TD), jnp.float32)],
        ),
        compiler_params=pltpu.CompilerParams(
            dimension_semantics=("parallel", "parallel", "arbitrary"),
            # Above v5e's 16 MiB default scoped limit, still safely under
            # v7x's 64 MiB physical VMEM (tiles themselves use < ~18 MiB).
            vmem_limit_bytes=48 << 20,
        ),
    )(x)

    return out[:B, :D]


def masked_average_pooling_ref(embedding_matrix):
    xf = embedding_matrix.astype(jnp.float32)
    summed = jnp.sum(xf, axis=1)
    count = jnp.sum((embedding_matrix != 0), axis=1).astype(jnp.float32)
    return summed / (count + 1e-16)


if __name__ == "__main__":
    key = jax.random.PRNGKey(0)

    # --- primary small example consistent with the module: (B, S, D) --------
    B, S, D = 2, 8, 32
    k1, k2 = jax.random.split(key)
    emb = jax.random.normal(k1, (B, S, D), dtype=jnp.float32)
    # Zero out trailing sequence positions per batch (simulated padding).
    pad_mask = (jnp.arange(S)[None, :, None] < jnp.array([5, 7])[:, None, None])
    emb = emb * pad_mask.astype(jnp.float32)

    out = masked_average_pooling(emb)
    out = jax.block_until_ready(out)
    ref = masked_average_pooling_ref(emb)
    assert out.shape == (B, D)
    assert jnp.allclose(out, ref, atol=1e-5, rtol=1e-5), "mismatch vs reference (case 1)"

    # --- second case: non-aligned shapes + forced multi-block S reduction ---
    B2, S2, D2 = 3, 20, 200
    emb2 = jax.random.normal(k2, (B2, S2, D2), dtype=jnp.float32)
    pad_mask2 = (jnp.arange(S2)[None, :, None]
                 < jnp.array([20, 11, 3])[:, None, None])
    emb2 = emb2 * pad_mask2.astype(jnp.float32)

    # Tiny VMEM budget forces TS=8 -> multiple sequence blocks (accumulator path).
    out2 = masked_average_pooling(emb2, vmem_tile_budget_bytes=1 << 16)
    out2 = jax.block_until_ready(out2)
    ref2 = masked_average_pooling_ref(emb2)
    assert out2.shape == (B2, D2)
    assert jnp.allclose(out2, ref2, atol=1e-5, rtol=1e-5), "mismatch vs reference (case 2)"

    print("KERNEL_OK")
</pallas_src>

<mosaic_0001>
module attributes {stable_mosaic.version = 11 : i64} {
  func.func @_masked_avg_pool_kernel(%arg0: i32, %arg1: i32, %arg2: i32, %arg3: memref<8x8x128xf32, #tpu.memory_space<vmem>>, %arg4: memref<8x128xf32, #tpu.memory_space<vmem>>, %arg5: memref<8x128xf32, #tpu.memory_space<vmem>>, %arg6: memref<8x128xf32, #tpu.memory_space<vmem>>) attributes {dimension_semantics = [#tpu.dimension_semantics<parallel>, #tpu.dimension_semantics<parallel>, #tpu.dimension_semantics<arbitrary>], iteration_bounds = array<i64: 1, 1, 1>, scalar_prefetch = 0 : i64, scratch_operands = 2 : i64, tpu.core_type = #tpu.core_type<tc>, window_params = [{transform_indices = @transform_0, window_bounds = array<i64: 8, 8, 128>}, {transform_indices = @transform_1, window_bounds = array<i64: 8, 128>}]} {
    %c0_i32 = arith.constant 0 : i32
    %0 = arith.cmpi eq, %arg2, %c0_i32 : i32
    %1 = arith.extui %0 : i1 to i32
    %c0_i32_0 = arith.constant 0 : i32
    %2 = arith.cmpi ne, %1, %c0_i32_0 : i32
    scf.if %2 {
      %cst_15 = arith.constant 0.000000e+00 : f32
      %19 = vector.broadcast %cst_15 : f32 to vector<8x128xf32>
      %c0_16 = arith.constant 0 : index
      %c0_17 = arith.constant 0 : index
      %20 = vector.load %arg5[%c0_16, %c0_17] : memref<8x128xf32, #tpu.memory_space<vmem>>, vector<8x128xf32>
      tpu.vector_store %arg5[%c0_16, %c0_17], %19 {strides = array<i32>} : memref<8x128xf32, #tpu.memory_space<vmem>>, vector<8x128xf32>,
      %cst_18 = arith.constant 0.000000e+00 : f32
      %21 = vector.broadcast %cst_18 : f32 to vector<8x128xf32>
      %c0_19 = arith.constant 0 : index
      %c0_20 = arith.constant 0 : index
      %22 = vector.load %arg6[%c0_19, %c0_20] : memref<8x128xf32, #tpu.memory_space<vmem>>, vector<8x128xf32>
      tpu.vector_store %arg6[%c0_19, %c0_20], %21 {strides = array<i32>} : memref<8x128xf32, #tpu.memory_space<vmem>>, vector<8x128xf32>,
    } else {
    }
    %c0 = arith.constant 0 : index
    %c0_1 = arith.constant 0 : index
    %c0_2 = arith.constant 0 : index
    %3 = vector.load %arg3[%c0, %c0_1, %c0_2] : memref<8x8x128xf32, #tpu.memory_space<vmem>>, vector<8x8x128xf32>
    %c0_3 = arith.constant 0 : index
    %c0_4 = arith.constant 0 : index
    %4 = vector.load %arg5[%c0_3, %c0_4] : memref<8x128xf32, #tpu.memory_space<vmem>>, vector<8x128xf32>
    %cst = arith.constant dense<0.000000e+00> : vector<8x128xf32>
    %5 = vector.multi_reduction <add>, %3, %cst [1] : vector<8x8x128xf32> to vector<8x128xf32>
    %6 = arith.addf %4, %5 : vector<8x128xf32>
    %c0_5 = arith.constant 0 : index
    %c0_6 = arith.constant 0 : index
    %7 = vector.load %arg5[%c0_5, %c0_6] : memref<8x128xf32, #tpu.memory_space<vmem>>, vector<8x128xf32>
    tpu.vector_store %arg5[%c0_5, %c0_6], %6 {strides = array<i32>} : memref<8x128xf32, #tpu.memory_space<vmem>>, vector<8x128xf32>,
    %c0_7 = arith.constant 0 : index
    %c0_8 = arith.constant 0 : index
    %8 = vector.load %arg6[%c0_7, %c0_8] : memref<8x128xf32, #tpu.memory_space<vmem>>, vector<8x128xf32>
    %cst_9 = arith.constant 0.000000e+00 : f32
    %9 = vector.broadcast %cst_9 : f32 to vector<8x8x128xf32>
    %10 = arith.cmpf one, %3, %9 : vector<8x8x128xf32>
    %11 = arith.extui %10 : vector<8x8x128xi1> to vector<8x8x128xi32>
    %12 = arith.sitofp %11 : vector<8x8x128xi32> to vector<8x8x128xf32>
    %cst_10 = arith.constant dense<0.000000e+00> : vector<8x128xf32>
    %13 = vector.multi_reduction <add>, %12, %cst_10 [1] : vector<8x8x128xf32> to vector<8x128xf32>
    %14 = arith.addf %8, %13 : vector<8x128xf32>
    %c0_11 = arith.constant 0 : index
    %c0_12 = arith.constant 0 : index
    %15 = vector.load %arg6[%c0_11, %c0_12] : memref<8x128xf32, #tpu.memory_space<vmem>>, vector<8x128xf32>
    tpu.vector_store %arg6[%c0_11, %c0_12], %14 {strides = array<i32>} : memref<8x128xf32, #tpu.memory_space<vmem>>, vector<8x128xf32>,
    %c0_i32_13 = arith.constant 0 : i32
    %16 = arith.cmpi eq, %arg2, %c0_i32_13 : i32
    %17 = arith.extui %16 : i1 to i32
    %c0_i32_14 = arith.constant 0 : i32
    %18 = arith.cmpi ne, %17, %c0_i32_14 : i32
    scf.if %18 {
      %c0_15 = arith.constant 0 : index
      %c0_16 = arith.constant 0 : index
      %19 = vector.load %arg5[%c0_15, %c0_16] : memref<8x128xf32, #tpu.memory_space<vmem>>, vector<8x128xf32>
      %c0_17 = arith.constant 0 : index
      %c0_18 = arith.constant 0 : index
      %20 = vector.load %arg6[%c0_17, %c0_18] : memref<8x128xf32, #tpu.memory_space<vmem>>, vector<8x128xf32>
      %cst_19 = arith.constant 1.000000e-16 : f32
      %21 = vector.broadcast %cst_19 : f32 to vector<8x128xf32>
      %22 = arith.addf %20, %21 : vector<8x128xf32>
      %23 = arith.divf %19, %22 : vector<8x128xf32>
      %c0_20 = arith.constant 0 : index
      %c0_21 = arith.constant 0 : index
      %24 = vector.load %arg4[%c0_20, %c0_21] : memref<8x128xf32, #tpu.memory_space<vmem>>, vector<8x128xf32>
      tpu.vector_store %arg4[%c0_20, %c0_21], %23 {strides = array<i32>} : memref<8x128xf32, #tpu.memory_space<vmem>>, vector<8x128xf32>,
    } else {
    }
    return
  }
  func.func @transform_0(%arg0: i32, %arg1: i32, %arg2: i32) -> (i32, i32, i32) {
    %c0_i32 = arith.constant 0 : i32
    return %arg0, %arg2, %arg1 : i32, i32, i32
  }
  func.func @transform_1(%arg0: i32, %arg1: i32, %arg2: i32) -> (i32, i32) {
    %c0_i32 = arith.constant 0 : i32
    return %arg0, %arg1 : i32, i32
  }
}

</mosaic_0001>

<bundles_post_ra>
// kernel: tpu_custom_call.1
= control target key start
LH: loop header
LB: loop body
LE: loop exit
PB: predicated region body
PF: predicated region fallthrough
CT: control target
= control target key end

     0   :  { %6 = vsyncpa [#allocation5], 0  ;;  %s356_s0 = inlined_call_operand.hbm [shape: f32[8,8,128], index: 0, kind: input, shape index: {}]   ;;  %s357_s1 = inlined_call_operand.hbm [shape: f32[8,128], index: 1, kind: output, shape index: {}]  }
   0x1   :  { %7 = vsyncpa [#allocation6], 0  ;;  %s285_s6 = smov [#allocation4]  }
   0x2   :  { %s13_s7 = sshll.u32 %s285_s6, 4  ;;  %s14_s7 = int_to_ptr.vmem [resolvable:$true] %s13_s7 }
   0x3   :  { %s249_s8 = scalar_lea.vmem %s14_s7, 1024  ;;  %p254_p1 = scmp.lt.s32.totalorder %s14_s7, %s14_s7 }
   0x4   :  { %p250_p0 = scmp.ne.s32.totalorder %s14_s7, %s249_s8  ;;  %p255_p2 = scmp.lt.s32.totalorder %s249_s8, %s249_s8 }
   0x6   :  { %p256_p3 = por %p255_p2, %p254_p1 }
   0x8   :  { %p257_p4 = pnand %p256_p3, %p250_p0 }
   0xa   :  { %260 = shalt.err (!%p257_p4)
}
   0xb   :  { %s286_s9 = smov 128   ;;  %s287_s10 = smov 8  }
   0xc   :  { %19 = dma.hbm_to_vmem [thread:$0]  %s356_s0, 1024, %s14_s7, [#allocation5], %s286_s9, %s286_s9, %s287_s10  }
   0xd   :  { %281 = dma.done.wait [#allocation5], 1024  }
   0xe   :  { %282 = vsyncadd [#allocation5], 4294966272  ;;  %v29_v0 = vld [vmem:[#allocation4] sm:$0xff]  ;;  %v30_v1 = vld [vmem:[#allocation4 + $0x8] sm:$0xff]  ;;  %v288_v35 = vmov 0.0   ;;  %vm94_vm8 = vcmask 1041409  }
   0xf   :  { %v31_v2 = vld [vmem:[#allocation4 + $0x10] sm:$0xff]  ;;  %v38_v3 = vrot.slane %v29_v0, 4  ;;  %v44_v4 = vrot.slane %v30_v1, 4  ;;  %v32_v6 = vld [vmem:[#allocation4 + $0x18] sm:$0xff]  ;;  %v33_v9 = vld [vmem:[#allocation4 + $0x20] sm:$0xff]  ;;  %vm112_vm0 = vcmp.ne.f32.partialorder %v29_v0, 0.0 }
  0x10   :  { %v50_v5 = vrot.slane %v31_v2, 4  ;;  %v56_v10 = vrot.slane %v32_v6, 4  ;;  %v34_v11 = vld [vmem:[#allocation4 + $0x28] sm:$0xff]  ;;  %v62_v13 = vrot.slane %v33_v9, 4  ;;  %v35_v16 = vld [vmem:[#allocation4 + $0x30] sm:$0xff]  ;;  %v307_v24 = vld [vmem:[#allocation4 + $0x38] sm:$0xff] }
  0x11   :  { %v39_v7 = vadd.f32 %v38_v3, %v29_v0  ;;  %v45_v8 = vadd.f32 %v44_v4, %v30_v1  ;;  %v68_v15 = vrot.slane %v34_v11, 4  ;;  %v74_v19 = vrot.slane %v35_v16, 4  ;;  %s289_s0 = smov [#allocation7]  }
  0x12   :  { %v51_v12 = vadd.f32 %v50_v5, %v31_v2  ;;  %v57_v18 = vadd.f32 %v56_v10, %v32_v6  ;;  %v303_v21 = vadd.f32 %v62_v13, %v33_v9  ;;  %v80_v28 = vrot.slane %v307_v24, 4  ;;  %s217_s13 = sshll.u32 %s289_s0, 4  ;;  %s218_s13 = int_to_ptr.vmem [resolvable:$true] %s217_s13 }
  0x13   :  { %v40_v14 = vrot.slane %v39_v7, 2  ;;  %v46_v17 = vrot.slane %v45_v8, 2  ;;  %v305_v23 = vadd.f32 %v68_v15, %v34_v11  ;;  %v309_v27 = vadd.f32 %v74_v19, %v35_v16  ;;  %s261_s14 = scalar_lea.vmem %s218_s13, 128  ;;  %p266_p6 = scmp.lt.s32.totalorder %s218_s13, %s218_s13 }
  0x14   :  { %v52_v20 = vrot.slane %v51_v12, 2  ;;  %v58_v26 = vrot.slane %v57_v18, 2  ;;  %v64_v30 = vrot.slane %v303_v21, 2  ;;  %vm113_vm1 = vcmp.ne.f32.partialorder %v30_v1, 0.0  ;;  %p262_p5 = scmp.ne.s32.totalorder %s218_s13, %s261_s14  ;;  %p267_p7 = scmp.lt.s32.totalorder %s261_s14, %s261_s14 }
  0x15   :  { %v41_v22 = vadd.f32 %v40_v14, %v39_v7  ;;  %v47_v25 = vadd.f32 %v46_v17, %v45_v8  ;;  %vm114_vm2 = vcmp.ne.f32.partialorder %v31_v2, 0.0  ;;  %v70_v32 = vrot.slane %v305_v23, 2 }
  0x16   :  { %v312_v29 = vadd.f32 %v52_v20, %v51_v12  ;;  %vm115_vm3 = vcmp.ne.f32.partialorder %v32_v6, 0.0  ;;  %vm116_vm4 = vcmp.ne.f32.partialorder %v33_v9, 0.0  ;;  %vm117_vm5 = vcmp.ne.f32.partialorder %v34_v11, 0.0  ;;  %p268_p8 = por %p267_p7, %p266_p6 }
  0x17   :  { %v42_v31 = vrot.slane %v41_v22, 1  ;;  %v48_v33 = vrot.slane %v47_v25, 1  ;;  %vm118_vm6 = vcmp.ne.f32.partialorder %v35_v16, 0.0  ;;  %vm119_vm7 = vcmp.ne.f32.partialorder %v307_v24, 0.0 }
  0x18   :  { %v317_v34 = vadd.f32 %v58_v26, %v57_v18  ;;  %v226_v36 = vsel %vm112_vm0, 1.0, %v288_v35  ;;  %v227_v37 = vsel %vm113_vm1, 1.0, %v288_v35  ;;  %v228_v38 = vsel %vm114_vm2, 1.0, %v288_v35  ;;  %p269_p9 = pnand %p268_p8, %p262_p5 }
  0x19   :  { %v54_v39 = vrot.slane %v312_v29, 1  ;;  %v229_v40 = vsel %vm115_vm3, 1.0, %v288_v35  ;;  %v230_v41 = vsel %vm116_vm4, 1.0, %v288_v35  ;;  %v231_v42 = vsel %vm117_vm5, 1.0, %v288_v35 }
  0x1a   :  { %v320_v43 = vadd.f32 %v42_v31, %v41_v22  ;;  %v232_v44 = vsel %vm118_vm6, 1.0, %v288_v35  ;;  %v233_v45 = vsel %vm119_vm7, 1.0, %v288_v35  ;;  %v136_v46 = vrot.slane %v226_v36, 4 }
  0x1b   :  { %v49_v47 = vadd.f32 %v48_v33, %v47_v25  ;;  %v142_v48 = vrot.slane %v227_v37, 4  ;;  %v148_v49 = vrot.slane %v228_v38, 4  ;;  %v154_v50 = vrot.slane %v229_v40, 4 }
  0x1c   :  { %v137_v51 = vadd.f32 %v226_v36, %v136_v46  ;;  %v160_v52 = vrot.slane %v230_v41, 4  ;;  %v166_v53 = vrot.slane %v231_v42, 4  ;;  %v172_v54 = vrot.slane %v232_v44, 4 }
  0x1d   :  { %vm96_vm9 = vcmask 1042434   ;;  %v143_v55 = vadd.f32 %v227_v37, %v142_v48  ;;  %v149_v56 = vadd.f32 %v228_v38, %v148_v49  ;;  %v155_v57 = vadd.f32 %v229_v40, %v154_v50 }
  0x1e   :  { %v178_v58 = vrot.slane %v233_v45, 4  ;;  %vm98_vm10 = vcmask 1043459   ;;  %v138_v59 = vrot.slane %v137_v51, 2  ;;  %v161_v60 = vadd.f32 %v230_v41, %v160_v52 }
  0x1f   :  { %v167_v61 = vadd.f32 %v231_v42, %v166_v53  ;;  %v173_v62 = vadd.f32 %v232_v44, %v172_v54  ;;  %vm100_vm11 = vcmask 1044484   ;;  %v144_v63 = vrot.slane %v143_v55, 2 }
  0x20   :  { %v150_v0 = vrot.slane %v149_v56, 2  ;;  %v156_v1 = vrot.slane %v155_v57, 2  ;;  %v179_v2 = vadd.f32 %v233_v45, %v178_v58  ;;  %v139_v3 = vadd.f32 %v138_v59, %v137_v51 }
  0x21   :  { %v162_v4 = vrot.slane %v161_v60, 2  ;;  %v168_v5 = vrot.slane %v167_v61, 2  ;;  %v174_v6 = vrot.slane %v173_v62, 2  ;;  %v145_v7 = vadd.f32 %v144_v63, %v143_v55 }
  0x22   :  { %v151_v8 = vadd.f32 %v150_v0, %v149_v56  ;;  %v157_v9 = vadd.f32 %v156_v1, %v155_v57  ;;  %v180_v10 = vrot.slane %v179_v2, 2  ;;  %v140_v11 = vrot.slane %v139_v3, 1 }
  0x23   :  { %v163_v12 = vadd.f32 %v162_v4, %v161_v60  ;;  %v169_v13 = vadd.f32 %v168_v5, %v167_v61  ;;  %v175_v14 = vadd.f32 %v174_v6, %v173_v62  ;;  %v146_v15 = vrot.slane %v145_v7, 1 }
  0x24   :  { %v152_v16 = vrot.slane %v151_v8, 1  ;;  %v158_v17 = vrot.slane %v157_v9, 1  ;;  %v181_v18 = vadd.f32 %v180_v10, %v179_v2  ;;  %v141_v19 = vadd.f32 %v140_v11, %v139_v3 }
  0x25   :  { %v164_v20 = vrot.slane %v163_v12, 1  ;;  %v170_v22 = vrot.slane %v169_v13, 1  ;;  %v176_v25 = vrot.slane %v175_v14, 1  ;;  %v147_v26 = vadd.f32 %v146_v15, %v145_v7 }
  0x26   :  { %v153_v31 = vadd.f32 %v152_v16, %v151_v8  ;;  %v159_v33 = vadd.f32 %v158_v17, %v157_v9  ;;  %v182_v35 = vrot.slane %v181_v18, 1  ;;  %v65_v36 = vadd.f32 %v64_v30, %v303_v21 }
  0x27   :  { %vm102_vm12 = vcmask 1045509   ;;  %vm104_vm13 = vcmask 1046534   ;;  %v165_v37 = vadd.f32 %v164_v20, %v163_v12  ;;  %v60_v38 = vrot.slane %v317_v34, 1 }
  0x28   :  { %v81_v40 = vadd.f32 %v80_v28, %v307_v24  ;;  %v171_v41 = vadd.f32 %v170_v22, %v169_v13  ;;  %v192_v42 = vsel %vm94_vm8, %v147_v26, %v141_v19  ;;  %v55_v44 = vadd.f32 %v54_v39, %v312_v29 }
  0x29   :  { %v76_v45 = vrot.slane %v309_v27, 2  ;;  %v177_v46 = vadd.f32 %v176_v25, %v175_v14  ;;  %v193_v21 = vsel %vm96_vm9, %v153_v31, %v192_v42  ;;  %v71_v30 = vadd.f32 %v70_v32, %v305_v23 }
  0x2a   :  { %v95_v48 = vsel %vm94_vm8, %v49_v47, %v320_v43  ;;  %v183_v24 = vadd.f32 %v182_v35, %v181_v18  ;;  %v194_v28 = vsel %vm98_vm10, %v159_v33, %v193_v21  ;;  %v66_v49 = vrot.slane %v65_v36, 1 }
  0x2b   :  { %vm106_vm14 = vcmask 1047559   ;;  %v195_v50 = vsel %vm100_vm11, %v165_v37, %v194_v28  ;;  %v61_v29 = vadd.f32 %v60_v38, %v317_v34  ;;  %v82_v39 = vrot.slane %v81_v40, 2 }
  0x2c   :  { %v196_v51 = vsel %vm102_vm12, %v171_v41, %v195_v50  ;;  %v77_v52 = vadd.f32 %v76_v45, %v309_v27  ;;  %v97_v53 = vsel %vm96_vm9, %v55_v44, %v95_v48  ;;  %v72_v32 = vrot.slane %v71_v30, 1 }
  0x2d   :  { %v197_v23 = vsel %vm104_vm13, %v177_v46, %v196_v51  ;;  %v67_v47 = vadd.f32 %v66_v49, %v65_v36  ;;  %v83_v55 = vadd.f32 %v82_v39, %v81_v40  ;;  %v99_v56 = vsel %vm98_vm10, %v61_v29, %v97_v53 }
  0x2e   :  { %v198_v43 = vsel %vm106_vm14, %v183_v24, %v197_v23  ;;  %v78_v57 = vrot.slane %v77_v52, 1  ;;  %v73_v34 = vadd.f32 %v72_v32, %v71_v30 }
  0x2f   :  { %v207_v54 = vadd.f32 1e-16, %v198_v43  ;;  %v101_v58 = vsel %vm100_vm11, %v67_v47, %v99_v56  ;;  %v84_v59 = vrot.slane %v83_v55, 1 }
  0x30   :  { %v79_v60 = vadd.f32 %v78_v57, %v77_v52  ;;  %v103_v27 = vsel %vm102_vm12, %v73_v34, %v101_v58 }
  0x31   :  { %239 = vrcp.f32 %v207_v54  ;;  %v85_v61 = vadd.f32 %v84_v59, %v83_v55 }
  0x32   :  { %v105_v62 = vsel %vm104_vm13, %v79_v60, %v103_v27 }
  0x33   :  { %v107_v63 = vsel %vm106_vm14, %v85_v61, %v105_v62 }
  0x3e   :  { %v240_v0 = vpop.eup %239 }
  0x3f   :  { %v209_v1 = vmul.f32 %v240_v0, %v107_v63 }
  0x41   :  { %210 = vst [vmem:[#allocation7] sm:$0xff] %v209_v1 }
  0x42   :  { %272 = shalt.err (!%p269_p9)
}
  0x43   :  { %220 = dma.vmem_to_hbm [thread:$0]  %s218_s13, 128, %s357_s1, [#allocation6]  }
  0x44   :  { %283 = dma.done.wait [#allocation6], 128  }
  0x45   :  { %284 = vsyncadd [#allocation6], 4294967168 }
  0x46   :  { %224 = vsyncpa [#allocation5], 1 }
  0x47   :  { %225 = vsyncpa [#allocation6], 1 }

</bundles_post_ra>
